<compile_context>
chip_gen: v7x
topology: tpu7x:2x2x1
jax: 0.10.0
libtpu: 0.0.40
codegen_flags: <defaults>
</compile_context>

<pallas_src>
import functools

import jax
import jax.numpy as jnp
from jax import lax
from jax.experimental import pallas as pl
from jax.experimental.pallas import tpu as pltpu


# ----------------------------------------------------------------------------
# Pallas kernels
# ----------------------------------------------------------------------------
def _gemm_bn_act_kernel(a_ref, b_ref, scale_ref, shift_ref, o_ref, acc_ref, *,
                        act, slope):
    """o = act((A @ B) * scale + shift); scale/shift broadcast over rows.

    A/B tiles are bf16 (MXU native); accumulation and epilogue stay in f32.
    """
    @pl.when(pl.program_id(2) == 0)
    def _init():
        acc_ref[...] = jnp.zeros_like(acc_ref)

    acc_ref[...] += jnp.dot(a_ref[...], b_ref[...],
                            preferred_element_type=jnp.float32)

    @pl.when(pl.program_id(2) == pl.num_programs(2) - 1)
    def _finalize():
        y = acc_ref[...] * scale_ref[...] + shift_ref[...]
        if act == 'relu':
            y = jnp.maximum(y, 0.0)
        elif act == 'leakyrelu':
            y = jnp.where(y >= 0.0, y, slope * y)
        o_ref[...] = y.astype(o_ref.dtype)


def _max_over_windows_kernel(x_ref, o_ref):
    """x: (kh*kw, L) window-stacked values -> o: (1, L) max over windows."""
    o_ref[...] = jnp.max(x_ref[...], axis=0, keepdims=True)


# ----------------------------------------------------------------------------
# Tiling helpers
# ----------------------------------------------------------------------------
def _round_up(x, m):
    return ((x + m - 1) // m) * m


def _m_tiles(M):
    Mp = _round_up(M, 16)            # bf16 sublane packing
    if Mp <= 256:
        return Mp, Mp                # one row block, right-sized to the real M
    return _round_up(M, 128), 128


def _k_tiles(K):
    Kp = _round_up(K, 128)
    if Kp <= 2048:
        return Kp, Kp                # single reduction step
    return _round_up(K, 1024), 1024


def _n_tiles(N):
    Np = _round_up(N, 128)
    if Np <= 512:
        return Np, Np                # one lane-dense output block
    return _round_up(N, 256), 256


# ----------------------------------------------------------------------------
# Pallas wrappers
# ----------------------------------------------------------------------------
def pallas_gemm_bn_act(a, b_p, scale_p, shift_p, act='relu', slope=0.2):
    """act((a @ b_p) * scale + shift).

    a:       (M, K)   f32 (cast to bf16 here)
    b_p:     (Kp, Np) bf16 pre-transposed / pre-padded weight
    scale_p: (1, Np)  f32 folded BN scale
    shift_p: (1, Np)  f32 folded BN shift (absorbs conv bias)
    returns  (M, Np)  f32
    """
    M, K = a.shape
    Kp, bk = _k_tiles(K)
    assert b_p.shape[0] == Kp, (b_p.shape, Kp)
    Np = b_p.shape[1]
    Np, bn = _n_tiles(Np)
    assert b_p.shape[1] == Np and scale_p.shape == (1, Np)
    Mp, bm = _m_tiles(M)

    a_p = a.astype(jnp.bfloat16)
    if (Mp, Kp) != (M, K):
        a_p = jnp.pad(a_p, ((0, Mp - M), (0, Kp - K)))

    grid = (Mp // bm, Np // bn, Kp // bk)
    out = pl.pallas_call(
        functools.partial(_gemm_bn_act_kernel, act=act, slope=slope),
        out_shape=jax.ShapeDtypeStruct((Mp, Np), jnp.float32),
        grid_spec=pltpu.PrefetchScalarGridSpec(
            num_scalar_prefetch=0,
            grid=grid,
            in_specs=[pl.BlockSpec((bm, bk), lambda i, j, k: (i, k)),
                      pl.BlockSpec((bk, bn), lambda i, j, k: (k, j)),
                      pl.BlockSpec((1, bn), lambda i, j, k: (0, j)),
                      pl.BlockSpec((1, bn), lambda i, j, k: (0, j))],
            out_specs=pl.BlockSpec((bm, bn), lambda i, j, k: (i, j)),
            scratch_shapes=[pltpu.VMEM((bm, bn), jnp.float32)]),
        compiler_params=pltpu.CompilerParams(
            dimension_semantics=("parallel", "parallel", "arbitrary")),
    )(a_p, b_p, scale_p, shift_p)
    return out[:M]


def _patches_nchw(x, kh, kw, stride, padding):
    """im2col glue: (B,C,H,W) -> (B, C*kh*kw, OH, OW); feature order (C,kh,kw)."""
    return lax.conv_general_dilated_patches(
        x, filter_shape=(kh, kw), window_strides=(stride, stride),
        padding=((padding, padding), (padding, padding)))


def conv_bn_act(x, prep, *, stride, padding, act='relu'):
    """Conv2d(+bias) + BatchNorm2d(eval) + activation as one fused Pallas GEMM."""
    B, C, H, W = x.shape
    kh, kw, cout = prep['kh'], prep['kw'], prep['cout']
    if kh == 1 and kw == 1 and stride == 1 and padding == 0:
        OH, OW = H, W
        a = x.transpose(0, 2, 3, 1).reshape(B * H * W, C)
    else:
        p = _patches_nchw(x, kh, kw, stride, padding)
        OH, OW = p.shape[2], p.shape[3]
        a = p.transpose(0, 2, 3, 1).reshape(B * OH * OW, C * kh * kw)
    out = pallas_gemm_bn_act(a, prep['w'], prep['scale'], prep['shift'], act=act)
    return out[:, :cout].reshape(B, OH, OW, cout).transpose(0, 3, 1, 2)


def maxpool2d(x, *, k=3, stride=2):
    """MaxPool2d(k, stride, padding=0): Pallas max-reduce over window positions."""
    B, C, H, W = x.shape
    p = _patches_nchw(x, k, k, stride, 0)                 # (B, C*k*k, OH, OW)
    OH, OW = p.shape[2], p.shape[3]
    L = B * C * OH * OW
    wins = (p.reshape(B, C, k * k, OH, OW)
             .transpose(2, 0, 1, 3, 4)
             .reshape(k * k, L))
    out = pl.pallas_call(
        _max_over_windows_kernel,
        out_shape=jax.ShapeDtypeStruct((1, L), jnp.float32),
        in_specs=[pl.BlockSpec(memory_space=pltpu.MemorySpace.VMEM)],
        out_specs=pl.BlockSpec(memory_space=pltpu.MemorySpace.VMEM),
    )(wins.astype(jnp.float32))
    return out.reshape(B, C, OH, OW)


# ----------------------------------------------------------------------------
# Parameters (PyTorch layouts) and one-time GEMM preparation
# ----------------------------------------------------------------------------
def init_params(key, in_channels, md_channels, add_channels):
    c_b1 = add_channels + 178
    c_b2 = add_channels + 302
    keys = iter(jax.random.split(key, 8))

    def conv_p(k, cout, cin, ksz):
        k1, k2, k3, k4, k5, k6 = jax.random.split(k, 6)
        fan_in = cin * ksz * ksz
        std = 1.0 / float(fan_in) ** 0.5
        return {
            'w': jax.random.normal(k1, (cout, cin, ksz, ksz), jnp.float32) * std,
            'b': jax.random.uniform(k2, (cout,), jnp.float32, -std, std),
            'gamma': 1.0 + 0.1 * jax.random.normal(k3, (cout,), jnp.float32),
            'beta': 0.1 * jax.random.normal(k4, (cout,), jnp.float32),
            'mean': 0.1 * jax.random.normal(k5, (cout,), jnp.float32),
            'var': jax.random.uniform(k6, (cout,), jnp.float32, 0.5, 1.5),
        }

    return {
        'b1_c1': conv_p(next(keys), md_channels, in_channels, 1),
        'b1_c2': conv_p(next(keys), c_b1, md_channels, 3),
        'b1_c3': conv_p(next(keys), c_b1, c_b1, 3),
        'b2_c1': conv_p(next(keys), md_channels, in_channels, 1),
        'b2_c2': conv_p(next(keys), c_b2, md_channels, 3),
    }


def prepare_params(params, bn_eps=1e-5):
    """One-time conversion: transpose/pad weights to bf16 (K, Np) matrices and
    fold BatchNorm (eval-mode running stats) + conv bias into f32 scale/shift."""

    def fold(p):
        scale = p['gamma'] / jnp.sqrt(p['var'] + bn_eps)
        shift = p['beta'] + scale * (p['b'] - p['mean'])
        return scale, shift

    def prep(layers):
        # layers with identical (Cin, kh, kw) are fused along out-channels (N)
        w = jnp.concatenate([p['w'] for p in layers], axis=0)
        cout, cin, kh, kw = w.shape
        K = cin * kh * kw
        Kp, _ = _k_tiles(K)
        Np, _ = _n_tiles(cout)
        wm = w.reshape(cout, K).T                       # (K, Cout), (Cin,kh,kw) order
        sc = jnp.concatenate([fold(p)[0] for p in layers])
        sh = jnp.concatenate([fold(p)[1] for p in layers])
        return {
            'w': jnp.pad(wm, ((0, Kp - K), (0, Np - cout))).astype(jnp.bfloat16),
            'scale': jnp.pad(sc, (0, Np - cout)).reshape(1, Np).astype(jnp.float32),
            'shift': jnp.pad(sh, (0, Np - cout)).reshape(1, Np).astype(jnp.float32),
            'cout': cout, 'kh': kh, 'kw': kw,
        }

    return {
        'stem': prep([params['b1_c1'], params['b2_c1']]),   # fused b1/b2 1x1 convs
        'b1_c2': prep([params['b1_c2']]),
        'b1_c3': prep([params['b1_c3']]),
        'b2_c2': prep([params['b2_c2']]),
    }


# ----------------------------------------------------------------------------
# InceptionModuleV2Reduce forward (eval mode: BN running stats)
# ----------------------------------------------------------------------------
def inception_v2_reduce_forward(prep, x, md_channels):
    # fused 1x1 stem: b1 and b2 share the input -> one GEMM, split channels after
    stem = conv_bn_act(x, prep['stem'], stride=1, padding=0, act='relu')
    b1 = stem[:, :md_channels]
    b2 = stem[:, md_channels:]
    # branch 1: 3x3 pad=1 -> 3x3 stride=2
    b1 = conv_bn_act(b1, prep['b1_c2'], stride=1, padding=1, act='relu')
    b1 = conv_bn_act(b1, prep['b1_c3'], stride=2, padding=0, act='relu')
    # branch 2: 3x3 stride=2
    b2 = conv_bn_act(b2, prep['b2_c2'], stride=2, padding=0, act='relu')
    # branch 3: maxpool 3x3 stride=2
    b3 = maxpool2d(x, k=3, stride=2)
    return jnp.concatenate([b1, b2, b3], axis=1)


# ----------------------------------------------------------------------------
if __name__ == "__main__":
    in_channels, md_channels, add_channels = 4, 8, 16
    B, H, W = 2, 16, 16

    key = jax.random.PRNGKey(0)
    k_params, k_x = jax.random.split(key)
    params = init_params(k_params, in_channels, md_channels, add_channels)
    prep = prepare_params(params)
    x = jax.random.normal(k_x, (B, in_channels, H, W), jnp.float32)

    out = inception_v2_reduce_forward(prep, x, md_channels)
    out = jax.block_until_ready(out)

    OH = (H - 3) // 2 + 1
    OW = (W - 3) // 2 + 1
    c_total = (add_channels + 178) + (add_channels + 302) + in_channels
    assert out.shape == (B, c_total, OH, OW), out.shape
    assert out.dtype == jnp.float32
    assert bool(jnp.all(jnp.isfinite(out)))
    print("KERNEL_OK")
</pallas_src>

<mosaic_0001>
module attributes {stable_mosaic.version = 11 : i64} {
  func.func @_gemm_bn_act_kernel(%arg0: i32, %arg1: i32, %arg2: i32, %arg3: memref<128x128xbf16, #tpu.memory_space<vmem>>, %arg4: memref<128x128xbf16, #tpu.memory_space<vmem>>, %arg5: memref<1x128xf32, #tpu.memory_space<vmem>>, %arg6: memref<1x128xf32, #tpu.memory_space<vmem>>, %arg7: memref<128x128xf32, #tpu.memory_space<vmem>>, %arg8: memref<128x128xf32, #tpu.memory_space<vmem>>) attributes {dimension_semantics = [#tpu.dimension_semantics<parallel>, #tpu.dimension_semantics<parallel>, #tpu.dimension_semantics<arbitrary>], iteration_bounds = array<i64: 4, 1, 1>, scalar_prefetch = 0 : i64, scratch_operands = 1 : i64, tpu.core_type = #tpu.core_type<tc>, window_params = [{transform_indices = @transform_0, window_bounds = array<i64: 128, 128>}, {transform_indices = @transform_1, window_bounds = array<i64: 128, 128>}, {transform_indices = @transform_2, window_bounds = array<i64: 1, 128>}, {transform_indices = @transform_3, window_bounds = array<i64: 1, 128>}, {transform_indices = @transform_4, window_bounds = array<i64: 128, 128>}]} {
    %c0_i32 = arith.constant 0 : i32
    %0 = arith.cmpi eq, %arg2, %c0_i32 : i32
    %1 = arith.extui %0 : i1 to i32
    %c0_i32_0 = arith.constant 0 : i32
    %2 = arith.cmpi ne, %1, %c0_i32_0 : i32
    scf.if %2 {
      %cst_10 = arith.constant 0.000000e+00 : f32
      %12 = vector.broadcast %cst_10 : f32 to vector<128x128xf32>
      %c0_11 = arith.constant 0 : index
      %c0_12 = arith.constant 0 : index
      %13 = vector.load %arg8[%c0_11, %c0_12] : memref<128x128xf32, #tpu.memory_space<vmem>>, vector<128x128xf32>
      tpu.vector_store %arg8[%c0_11, %c0_12], %12 {strides = array<i32>} : memref<128x128xf32, #tpu.memory_space<vmem>>, vector<128x128xf32>,
    } else {
    }
    %c0 = arith.constant 0 : index
    %c0_1 = arith.constant 0 : index
    %3 = vector.load %arg8[%c0, %c0_1] : memref<128x128xf32, #tpu.memory_space<vmem>>, vector<128x128xf32>
    %c0_2 = arith.constant 0 : index
    %c0_3 = arith.constant 0 : index
    %4 = vector.load %arg3[%c0_2, %c0_3] : memref<128x128xbf16, #tpu.memory_space<vmem>>, vector<128x128xbf16>
    %c0_4 = arith.constant 0 : index
    %c0_5 = arith.constant 0 : index
    %5 = vector.load %arg4[%c0_4, %c0_5] : memref<128x128xbf16, #tpu.memory_space<vmem>>, vector<128x128xbf16>
    %cst = arith.constant dense<0.000000e+00> : vector<128x128xf32>
    %6 = tpu.matmul %4, %5, %cst {dimension_numbers = #tpu.dot_dimension_numbers<[1], [0], [0], [1], [0, 0, 1, 1], [], []>} : vector<128x128xbf16>, vector<128x128xbf16>, vector<128x128xf32> -> vector<128x128xf32>
    %7 = arith.addf %3, %6 : vector<128x128xf32>
    %c0_6 = arith.constant 0 : index
    %c0_7 = arith.constant 0 : index
    %8 = vector.load %arg8[%c0_6, %c0_7] : memref<128x128xf32, #tpu.memory_space<vmem>>, vector<128x128xf32>
    tpu.vector_store %arg8[%c0_6, %c0_7], %7 {strides = array<i32>} : memref<128x128xf32, #tpu.memory_space<vmem>>, vector<128x128xf32>,
    %c0_i32_8 = arith.constant 0 : i32
    %9 = arith.cmpi eq, %arg2, %c0_i32_8 : i32
    %10 = arith.extui %9 : i1 to i32
    %c0_i32_9 = arith.constant 0 : i32
    %11 = arith.cmpi ne, %10, %c0_i32_9 : i32
    scf.if %11 {
      %c0_10 = arith.constant 0 : index
      %c0_11 = arith.constant 0 : index
      %12 = vector.load %arg8[%c0_10, %c0_11] : memref<128x128xf32, #tpu.memory_space<vmem>>, vector<128x128xf32>
      %c0_12 = arith.constant 0 : index
      %c0_13 = arith.constant 0 : index
      %13 = vector.load %arg5[%c0_12, %c0_13] : memref<1x128xf32, #tpu.memory_space<vmem>>, vector<1x128xf32>
      %14 = vector.broadcast %13 : vector<1x128xf32> to vector<128x128xf32>
      %15 = arith.mulf %12, %14 : vector<128x128xf32>
      %c0_14 = arith.constant 0 : index
      %c0_15 = arith.constant 0 : index
      %16 = vector.load %arg6[%c0_14, %c0_15] : memref<1x128xf32, #tpu.memory_space<vmem>>, vector<1x128xf32>
      %17 = vector.broadcast %16 : vector<1x128xf32> to vector<128x128xf32>
      %18 = arith.addf %15, %17 : vector<128x128xf32>
      %cst_16 = arith.constant 0.000000e+00 : f32
      %19 = vector.broadcast %cst_16 : f32 to vector<128x128xf32>
      %20 = arith.maximumf %18, %19 : vector<128x128xf32>
      %c0_17 = arith.constant 0 : index
      %c0_18 = arith.constant 0 : index
      %21 = vector.load %arg7[%c0_17, %c0_18] : memref<128x128xf32, #tpu.memory_space<vmem>>, vector<128x128xf32>
      tpu.vector_store %arg7[%c0_17, %c0_18], %20 {strides = array<i32>} : memref<128x128xf32, #tpu.memory_space<vmem>>, vector<128x128xf32>,
    } else {
    }
    return
  }
  func.func @transform_0(%arg0: i32, %arg1: i32, %arg2: i32) -> (i32, i32) {
    %c0_i32 = arith.constant 0 : i32
    return %arg0, %arg2 : i32, i32
  }
  func.func @transform_1(%arg0: i32, %arg1: i32, %arg2: i32) -> (i32, i32) {
    %c0_i32 = arith.constant 0 : i32
    return %arg2, %arg1 : i32, i32
  }
  func.func @transform_2(%arg0: i32, %arg1: i32, %arg2: i32) -> (i32, i32) {
    %c0_i32 = arith.constant 0 : i32
    %c0_i32_0 = arith.constant 0 : i32
    return %c0_i32, %arg1 : i32, i32
  }
  func.func @transform_3(%arg0: i32, %arg1: i32, %arg2: i32) -> (i32, i32) {
    %c0_i32 = arith.constant 0 : i32
    %c0_i32_0 = arith.constant 0 : i32
    return %c0_i32, %arg1 : i32, i32
  }
  func.func @transform_4(%arg0: i32, %arg1: i32, %arg2: i32) -> (i32, i32) {
    %c0_i32 = arith.constant 0 : i32
    return %arg0, %arg1 : i32, i32
  }
}

</mosaic_0001>

<bundles_post_ra>
// kernel: tpu_custom_call.1
= control target key start
LH: loop header
LB: loop body
LE: loop exit
PB: predicated region body
PF: predicated region fallthrough
CT: control target
= control target key end

     0   :  { %9 = vsyncpa [#allocation4], 0  ;;  %s1498_s0 = inlined_call_operand.hbm [shape: bf16[512,128], index: 0, kind: input, shape index: {}]   ;;  %s1499_s1 = inlined_call_operand.hbm [shape: bf16[128,128], index: 1, kind: input, shape index: {}]   ;;  %s1500_s2 = inlined_call_operand.vmem [shape: f32[1,128], index: 2, kind: input, shape index: {}]   ;;  %s1501_s3 = inlined_call_operand.vmem [shape: f32[1,128], index: 3, kind: input, shape index: {}]   ;;  %s1502_s4 = inlined_call_operand.hbm [shape: f32[512,128], index: 4, kind: output, shape index: {}]  }
   0x1   :  { %11 = vsyncpa [#allocation4 + $0x1], 0 }
   0x2   :  { %12 = vsyncpa [#allocation7], 0 }
   0x3   :  { %13 = vsyncpa [#allocation5], 0 }
   0x4   :  { %15 = vsyncpa [#allocation5 + $0x1], 0  ;;  %s1203_s15 = smov 0   ;;  %s1205_s16 = smov 0  }
   0x5   :  { %s1207_s17 = smov 0   ;;  %s1209_s18 = smov 0  }
   0x6   :  { %s1211_s19 = smov 0   ;;  %s1213_s20 = smov 0  }
   0x7 LB: > { %s829_s21 = sadd.s32 4294967295, %s1169_s20   ;;  %s830_s22 = sadd.s32 4294967294, %s1169_s20   ;;  %s1169_s20 = sphi %s1213_s20, %s21_s20   ;;  %s1165_s19 = sphi %s1211_s19, %s1525_s19   ;;  %s1161_s18 = sphi %s1209_s18, %s1524_s18   ;;  %s1157_s17 = sphi %s1207_s17, %s1523_s17   ;;  %s1153_s16 = sphi %s1205_s16, %s1522_s16   ;;  %s1149_s15 = sphi %s1203_s15, %s1521_s15  }
   0x8   : > { %p62_p0 = scmp.ne.s32.totalorder %s1153_s16, %s1149_s15  ;;  %p1237_p1 = scmp.eq.s32.totalorder %s829_s21, 0 }
   0x9   : > { %p1241_p2 = scmp.eq.s32.totalorder %s829_s21, 3  ;;  %p174_p3 = scmp.eq.s32.totalorder %s830_s22, 3 }
   0xa   : > { %s1507_s23 = scalar_select %p1237_p1, 1, 0 }
   0xb   : > { %s1508_s24 = scalar_select %p1241_p2, 1, 0 }
   0xc   : > { %p1247_p4 = por %p1237_p1, %p62_p0  ;;  %p831_p5 = scmp.ge.s32.totalorder %s1169_s20, 1 }
   0xd   : > { %p1252_p6 = por %p174_p3, %p62_p0  ;;  %p181_p7 = scmp.lt.s32.totalorder %s1169_s20, 5 }
   0xe   : > { %s1509_s25 = scalar_select %p1247_p4, 1, 0 }
   0xf   : > { %s1510_s26 = scalar_select %p1252_p6, 1, 0 }
  0x10   : > { %p1257_p8 = pnand %p831_p5, %p181_p7  ;;  %s1171_s28 = smov [#allocation6]  }
  0x11   : > { %s197_s29 = sshll.u32 %s1171_s28, 4  ;;  %s40_s5 = sadd.s32 1, %s1165_s19  ;;  %s198_s29 = int_to_ptr.vmem [resolvable:$true] %s197_s29 }
  0x12   : > { %s1511_s27 = scalar_select %p1257_p8, 1, 0 }
  0x13   : > { %p940_p9 = pneg %p1257_p8  ;;  %s1025_s8 = scalar_lea.hbm %s1499_s1, 1024 }
  0x14   : > { %p1026_p11 = scmp.ne.s32.totalorder %s1499_s1, %s1025_s8  ;;  %p1032_p3 = scmp.lt.u32.totalorder %s1025_s8, %s1499_s1 }
  0x15   : > { %p1265_p10 = pnand %p940_p9, %p1237_p1 }
  0x17   : > { %p1027_p12 = pneg %p1265_p10 }
  0x19   : > { %p1028_p13 = pnand %p1027_p12, %p1026_p11 }
  0x1b   : > { %p1029_p0 = pneg %p1028_p13 }
  0x1d   : > { %p1034_p5 = pnand %p1032_p3, %p1029_p0 }
  0x1f   : > { %1037 = shalt.err (!%p1034_p5)
}
  0x20   : > { %s1038_s13 = scalar_lea.vmem %s198_s29, 1024  ;;  %p1046_p1 = scmp.lt.s32.totalorder %s198_s29, %s198_s29 }
  0x21   : > { %p1039_p7 = scmp.ne.s32.totalorder %s198_s29, %s1038_s13  ;;  %p1047_p4 = scmp.lt.s32.totalorder %s1038_s13, %s1038_s13 }
  0x23   : > { %p1041_p9 = pnand %p1039_p7, %p1027_p12  ;;  %p1048_p8 = por %p1047_p4, %p1046_p1 }
  0x25   : > { %p1042_p6 = pneg %p1041_p9 }
  0x27   : > { %p1049_p2 = pnand %p1048_p8, %p1042_p6 }
  0x29   : > { %1052 = shalt.err (!%p1049_p2)
}
  0x2a   : > { %s1172_s14 = smov 64   ;;  %s1173_s21 = smov 4  }
  0x2b   : > { %943 = dma.hbm_to_vmem [thread:$0]  (!%p1265_p10), %s1499_s1, 1024, %s198_s29, [#allocation7], %s1172_s14, %s1172_s14, %s1173_s21  }
  0x2c   : > { %p42_p1 = scmp.ge.s32.totalorder %s40_s5, 4  ;;  %s49_s6 = sadd.s32 1, %s1157_s17 }
  0x2d   : > { %p56_p2 = scmp.ne.s32.totalorder %s1157_s17, %s1153_s16  ;;  %p57_p4 = scmp.eq.s32.totalorder %s1169_s20, 0 }
  0x2e   : > { %s1527_s5 = smov (%p42_p1, %s40_s5), 0  ;;  %p1514_p8 = scmp.ne.s32.totalorder %s1508_s24, 0 }
  0x2f   : > { %p1295_p6 = por %p57_p4, %p56_p2  ;;  %s44_s8 = ssub.s32 %s1165_s19, %s1527_s5 }
  0x30   : > { %p1301_p11 = por %p1514_p8, %p56_p2  ;;  %p953_p12 = scmp.lt.s32.totalorder %s1169_s20, 4 }
  0x31   : > { %p47_p10 = scmp.eq.s32.totalorder %s44_s8, 0  ;;  %s223_s29 = sand.u32 1, %s1157_s17  }
  0x32   : > { %s836_s9 = sshll.u32 %s223_s29, 6  ;;  %s866_s11 = sshll.u32 %s1165_s19, 10 }
  0x33   : > { %s1310_s10 = scalar_select %p47_p10, %s1157_s17, %s49_s6  }
  0x34   : > { %s1316_s22 = scalar_lea.hbm %s1498_s0, %s866_s11  ;;  %s227_s24 = scalar_lea.vmem [#allocation3], %s836_s9 }
  0x35   : > { %s235_s28 = sshll.u32 %s227_s24, 4  ;;  %p1322_p13 = pnand %p953_p12, %p1295_p6  ;;  %s1318_s28 = int_to_ptr.vmem [resolvable:$true] %s235_s28 }
  0x36   : > { %s1326_s6 = scalar_lea.sflag [#allocation4], %s223_s29  ;;  %s1053_s12 = scalar_lea.hbm %s1316_s22, 1024 }
  0x37   : > { %p1054_p0 = scmp.ne.s32.totalorder %s1316_s22, %s1053_s12  ;;  %p1055_p3 = pneg %p1322_p13 }
  0x38   : > { %s1058_s7 = scalar_lea.hbm %s1498_s0, 4096  ;;  %p1059_p9 = scmp.lt.u32.totalorder %s1316_s22, %s1498_s0 }
  0x39   : > { %p1056_p5 = pnand %p1055_p3, %p1054_p0  ;;  %p1060_p1 = scmp.lt.u32.totalorder %s1058_s7, %s1053_s12 }
  0x3a   : > { %p1062_p4 = scmp.lt.u32.totalorder %s1053_s12, %s1316_s22 }
  0x3b   : > { %p1057_p7 = pneg %p1056_p5  ;;  %p1061_p2 = por %p1060_p1, %p1059_p9 }
  0x3d   : > { %p1063_p6 = por %p1062_p4, %p1061_p2 }
  0x3f   : > { %p1064_p8 = pnand %p1063_p6, %p1057_p7 }
  0x41   : > { %1067 = shalt.err (!%p1064_p8)
}
  0x42   : > { %s1068_s29 = scalar_lea.vmem %s1318_s28, 1024  ;;  %s1174_s9 = smov [#allocation3]  }
  0x43   : > { %p1069_p12 = scmp.ne.s32.totalorder %s1318_s28, %s1068_s29  ;;  %s1073_s11 = sshll.u32 %s1174_s9, 4  ;;  %s1074_s11 = int_to_ptr.vmem [resolvable:$false] %s1073_s11 }
  0x44   : > { %s1075_s13 = scalar_lea.vmem %s1074_s11, 2048  ;;  %p1076_p5 = scmp.lt.s32.totalorder %s1318_s28, %s1074_s11 }
  0x45   : > { %p1071_p10 = pnand %p1069_p12, %p1055_p3  ;;  %p1077_p9 = scmp.lt.s32.totalorder %s1075_s13, %s1068_s29 }
  0x47   : > { %p1072_p0 = pneg %p1071_p10  ;;  %p1078_p1 = por %p1077_p9, %p1076_p5 }
  0x49   : > { %p1079_p2 = pnand %p1078_p1, %p1072_p0 }
  0x4b   : > { %1082 = shalt.err (!%p1079_p2)
}
  0x4c   : > { %947 = dma.hbm_to_vmem [thread:$0]  (!%p1322_p13), %s1316_s22, 1024, %s1318_s28, %s1326_s6, %s1172_s14, %s1172_s14, %s1173_s21  }
  0x4d   : > { %p1517_p3 = scmp.ne.s32.totalorder %s1511_s27, 0 }
  0x4e   : > { %s1360_s12 = sand.u32 (!%p1517_p3), 1, %s1153_s16   ;;  %p1518_p7 = scmp.ne.s32.totalorder (!%p1517_p3), %s1509_s25, 0 }
  0x4f   : > { %247 = sbr.rel (%p1517_p3) target bundleno = 367 (0x16f), region = 36  ;;  %s840_s7 = sshll.u32 (!%p1517_p3), %s1360_s12, 6 }
  0x50   : > { %s250_s24 = scalar_lea.sflag (!%p1517_p3), [#allocation4], %s1360_s12  ;;  %s1364_s29 = scalar_lea.vmem (!%p1517_p3), [#allocation3], %s840_s7 }
  0x56   : > { %1136 = dma.done.wait (%p1518_p7), %s250_s24, 1024  }
  0x57   : > { %1138 = vsyncadd (%p1518_p7), %s250_s24, 4294966272  ;;  %p1519_p13 = scmp.ne.s32.totalorder %s1507_s23, 0 }
  0x59   : > { %1140 = dma.done.wait (%p1519_p13), [#allocation7], 1024  }
  0x5a   : > { %1142 = vsyncadd (%p1519_p13), [#allocation7], 4294966272  ;;  %v1009_v0 = vld [vmem:[#allocation6] sm:$0xff]   ;;  %v1010_v1 = vld [vmem:[#allocation6 + $0x8] sm:$0xff]   ;;  %s842_s21 = sshll.u32 %s1360_s12, 7  ;;  %s867_s28 = sshll.u32 %s1161_s18, 11 }
  0x5b   : > { %884 = vmatprep.subr.bf16.mxu0 %v1009_v0  ;;  %916 = vmatprep.subr.bf16.mxu1 %v1009_v0  ;;  %v1011_v2 = vld [vmem:[#allocation6 + $0x10] sm:$0xff]   ;;  %v1012_v3 = vld [vmem:[#allocation6 + $0x18] sm:$0xff]   ;;  %v1017_v4 = vld [vmem:[%s1364_s29] sm:$0xff]   ;;  %s1409_s22 = scalar_lea.vmem [#allocation8], %s842_s21  ;;  %s1442_s9 = scalar_lea.hbm %s1502_s4, %s867_s28 }
  0x5c   : > { %885 = vmatpush3.bf16.msra.mxu0 %v1009_v0  ;;  %924 = vmatpush3.bf16.msra.mxu1 %v1009_v0  ;;  %v1018_v5 = vld [vmem:[%s1364_s29 + $0x20] sm:$0xff]   ;;  %v1014_v7 = vld [vmem:[#allocation6 + $0x28] sm:$0xff]   ;;  %v1015_v8 = vld [vmem:[#allocation6 + $0x30] sm:$0xff]   ;;  %s703_s8 = sshll.u32 %s1409_s22, 4  ;;  %s689_s11 = scalar_lea.sflag [#allocation5], %s1360_s12  ;;  %s1444_s8 = int_to_ptr.vmem [resolvable:$true] %s703_s8 }
  0x5d   : > { %886 = vmatprep.subr.bf16.mxu0 %v1010_v1  ;;  %917 = vmatprep.subr.bf16.mxu1 %v1010_v1  ;;  %v1013_v6 = vld [vmem:[#allocation6 + $0x20] sm:$0xff]   ;;  %v1016_v9 = vld [vmem:[#allocation6 + $0x38] sm:$0xff]   ;;  %v1019_v10 = vld [vmem:[%s1364_s29 + $0x8] sm:$0xff]   ;;  %s1083_s13 = scalar_lea.vmem %s1444_s8, 2048  ;;  %s1175_s7 = smov [#allocation8]  }
  0x5e   : > { %900 = vmatprep.mubr.bf16.mxu0 %v1017_v4  ;;  %908 = vmatprep.mubr.bf16.mxu1 %v1018_v5  ;;  %v1020_v11 = vld [vmem:[%s1364_s29 + $0x28] sm:$0xff]   ;;  %v1021_v12 = vld [vmem:[%s1364_s29 + $0x10] sm:$0xff]   ;;  %v1023_v14 = vld [vmem:[%s1364_s29 + $0x18] sm:$0xff]   ;;  %p1084_p4 = scmp.ne.s32.totalorder %s1444_s8, %s1083_s13  ;;  %s1087_s24 = sshll.u32 %s1175_s7, 4  ;;  %s1088_s24 = int_to_ptr.vmem [resolvable:$false] %s1087_s24 }
  0x5f   : > { %v1022_v13 = vld [vmem:[%s1364_s29 + $0x30] sm:$0xff]   ;;  %v1024_v15 = vld [vmem:[%s1364_s29 + $0x38] sm:$0xff]   ;;  %v1385_v16 = vld [vmem:[%s1500_s2] ss:$0 sm:$0xff]  ;;  %s1089_s29 = scalar_lea.vmem %s1088_s24, 4096  ;;  %p1090_p12 = scmp.lt.s32.totalorder %s1444_s8, %s1088_s24 }
  0x60   : > { %887 = vmatpush3.bf16.msra.mxu0 %v1010_v1  ;;  %925 = vmatpush3.bf16.msra.mxu1 %v1010_v1  ;;  %v1390_v18 = vld [vmem:[%s1501_s3] ss:$0 sm:$0xff]  ;;  %p1085_p6 = pnand %p1084_p4, %p1301_p11  ;;  %p1091_p10 = scmp.lt.s32.totalorder %s1089_s29, %s1083_s13 }
  0x61   : > { %888 = vmatprep.subr.bf16.mxu0 %v1011_v2  ;;  %918 = vmatprep.subr.bf16.mxu1 %v1011_v2 }
  0x62   : > { %p1086_p8 = pneg %p1085_p6  ;;  %p1092_p0 = por %p1091_p10, %p1090_p12 }
  0x64   : > { %889 = vmatpush3.bf16.msra.mxu0 %v1011_v2  ;;  %926 = vmatpush3.bf16.msra.mxu1 %v1011_v2  ;;  %p1093_p5 = pnand %p1092_p0, %p1086_p8 }
  0x65   : > { %890 = vmatprep.subr.bf16.mxu0 %v1012_v3  ;;  %919 = vmatprep.subr.bf16.mxu1 %v1012_v3 }
  0x68   : > { %891 = vmatpush3.bf16.msra.mxu0 %v1012_v3  ;;  %927 = vmatpush3.bf16.msra.mxu1 %v1012_v3 }
  0x69   : > { %892 = vmatprep.subr.bf16.mxu0 %v1013_v6  ;;  %920 = vmatprep.subr.bf16.mxu1 %v1013_v6 }
  0x6c   : > { %893 = vmatpush3.bf16.msra.mxu0 %v1013_v6  ;;  %928 = vmatpush3.bf16.msra.mxu1 %v1013_v6 }
  0x6d   : > { %894 = vmatprep.subr.bf16.mxu0 %v1014_v7  ;;  %921 = vmatprep.subr.bf16.mxu1 %v1014_v7 }
  0x70   : > { %895 = vmatpush3.bf16.msra.mxu0 %v1014_v7  ;;  %929 = vmatpush3.bf16.msra.mxu1 %v1014_v7 }
  0x71   : > { %896 = vmatprep.subr.bf16.mxu0 %v1015_v8  ;;  %922 = vmatprep.subr.bf16.mxu1 %v1015_v8 }
  0x74   : > { %897 = vmatpush3.bf16.msra.mxu0 %v1015_v8  ;;  %930 = vmatpush3.bf16.msra.mxu1 %v1015_v8 }
  0x75   : > { %898 = vmatprep.subr.bf16.mxu0 %v1016_v9  ;;  %923 = vmatprep.subr.bf16.mxu1 %v1016_v9 }
  0x78   : > { %899 = vmatpush3.bf16.msra.mxu0 %v1016_v9  ;;  %931 = vmatpush3.bf16.msra.mxu1 %v1016_v9 }
  0x7b   : > { %901 = vmatmul.mubr.bf16.vlgmr.msra.gmra.mrb[0].mxu0 %v1019_v10  ;;  %909 = vmatmul.mubr.bf16.vlgmr.msra.gmra.mrb[0].mxu1 %v1020_v11 }
  0x7c   : > { %904 = vmatprep.mubr.bf16.mxu0 %v1021_v12  ;;  %912 = vmatprep.mubr.bf16.mxu1 %v1022_v13 }
  0x83   : > { %905 = vmatmul.mubr.bf16.gmra.mrb[4].mxu0 %v1023_v14  ;;  %913 = vmatmul.mubr.bf16.gmra.mrb[4].mxu1 %v1024_v15 }
 0x14e   : > { %v902_v17 = vpop.f32.mrb[0].mxu0  ;;  %v910_v19 = vpop.f32.mrb[0].mxu1 }
 0x14f   : > { %v619_v20 = vmul.f32 %v902_v17, %v1385_v16  ;;  %v627_v21 = vmul.f32 %v910_v19, %v1385_v16  ;;  %v496_v22 = vpop.f32.mrb[1].mxu0  ;;  %v528_v23 = vpop.f32.mrb[1].mxu1 }
 0x150   : > { %v617_v24 = vmul.f32 %v1385_v16, %v496_v22  ;;  %v625_v25 = vmul.f32 %v1385_v16, %v528_v23  ;;  %v903_v26 = vpop.f32.mrb[2].mxu0  ;;  %v911_v27 = vpop.f32.mrb[2].mxu1 }
 0x151   : > { %v642_v28 = vadd.f32 %v1390_v18, %v619_v20  ;;  %v650_v29 = vadd.f32 %v1390_v18, %v627_v21  ;;  %v620_v30 = vmul.f32 %v903_v26, %v1385_v16  ;;  %v628_v31 = vmul.f32 %v911_v27, %v1385_v16  ;;  %v499_v32 = vpop.f32.mrb[3].mxu0  ;;  %v531_v33 = vpop.f32.mrb[3].mxu1 }
 0x152   : > { %v640_v34 = vadd.f32 %v1390_v18, %v617_v24  ;;  %v648_v35 = vadd.f32 %v1390_v18, %v625_v25  ;;  %v618_v36 = vmul.f32 %v1385_v16, %v499_v32  ;;  %v626_v37 = vmul.f32 %v1385_v16, %v531_v33 }
 0x153   : > { %v658_v38 = vmax.f32 %v642_v28, 0.0  ;;  %v666_v39 = vmax.f32 %v650_v29, 0.0  ;;  %v643_v40 = vadd.f32 %v1390_v18, %v620_v30  ;;  %v651_v41 = vadd.f32 %v1390_v18, %v628_v31 }
 0x154   : > { %v656_v42 = vmax.f32 %v640_v34, 0.0  ;;  %v664_v43 = vmax.f32 %v648_v35, 0.0  ;;  %v641_v44 = vadd.f32 %v1390_v18, %v618_v36  ;;  %v649_v45 = vadd.f32 %v1390_v18, %v626_v37 }
 0x155   : > { %674 = vst [vmem:[%s1409_s22 + $0x10] sm:$0xff] %v658_v38  ;;  %682 = vst [vmem:[%s1409_s22 + $0x50] sm:$0xff] %v666_v39  ;;  %v659_v46 = vmax.f32 %v643_v40, 0.0  ;;  %v667_v47 = vmax.f32 %v651_v41, 0.0 }
 0x156   : > { %672 = vst [vmem:[%s1409_s22] sm:$0xff] %v656_v42  ;;  %680 = vst [vmem:[%s1409_s22 + $0x40] sm:$0xff] %v664_v43  ;;  %v657_v48 = vmax.f32 %v641_v44, 0.0  ;;  %v665_v49 = vmax.f32 %v649_v45, 0.0  ;;  %v906_v50 = vpop.f32.mrb[4].mxu0  ;;  %v914_v51 = vpop.f32.mrb[4].mxu1 }
 0x157   : > { %675 = vst [vmem:[%s1409_s22 + $0x18] sm:$0xff] %v659_v46  ;;  %683 = vst [vmem:[%s1409_s22 + $0x58] sm:$0xff] %v667_v47  ;;  %v623_v52 = vmul.f32 %v906_v50, %v1385_v16  ;;  %v631_v53 = vmul.f32 %v914_v51, %v1385_v16  ;;  %v512_v54 = vpop.f32.mrb[5].mxu0  ;;  %v544_v55 = vpop.f32.mrb[5].mxu1 }
 0x158   : > { %673 = vst [vmem:[%s1409_s22 + $0x8] sm:$0xff] %v657_v48  ;;  %681 = vst [vmem:[%s1409_s22 + $0x48] sm:$0xff] %v665_v49  ;;  %v621_v56 = vmul.f32 %v1385_v16, %v512_v54  ;;  %v629_v57 = vmul.f32 %v1385_v16, %v544_v55  ;;  %v907_v58 = vpop.f32.mrb[6].mxu0  ;;  %v915_v59 = vpop.f32.mrb[6].mxu1 }
 0x159   : > { %v646_v60 = vadd.f32 %v1390_v18, %v623_v52  ;;  %v654_v61 = vadd.f32 %v1390_v18, %v631_v53  ;;  %v624_v62 = vmul.f32 %v907_v58, %v1385_v16  ;;  %v632_v63 = vmul.f32 %v915_v59, %v1385_v16  ;;  %v515_v0 = vpop.f32.mrb[7].mxu0  ;;  %v547_v1 = vpop.f32.mrb[7].mxu1 }
 0x15a   : > { %v644_v2 = vadd.f32 %v1390_v18, %v621_v56  ;;  %v652_v3 = vadd.f32 %v1390_v18, %v629_v57  ;;  %v622_v4 = vmul.f32 %v1385_v16, %v515_v0  ;;  %v630_v5 = vmul.f32 %v1385_v16, %v547_v1 }
 0x15b   : > { %v662_v6 = vmax.f32 %v646_v60, 0.0  ;;  %v670_v7 = vmax.f32 %v654_v61, 0.0  ;;  %v647_v8 = vadd.f32 %v1390_v18, %v624_v62  ;;  %v655_v9 = vadd.f32 %v1390_v18, %v632_v63 }
 0x15c   : > { %v660_v10 = vmax.f32 %v644_v2, 0.0  ;;  %v668_v11 = vmax.f32 %v652_v3, 0.0  ;;  %v645_v12 = vadd.f32 %v1390_v18, %v622_v4  ;;  %v653_v13 = vadd.f32 %v1390_v18, %v630_v5 }
 0x15d   : > { %678 = vst [vmem:[%s1409_s22 + $0x30] sm:$0xff] %v662_v6  ;;  %686 = vst [vmem:[%s1409_s22 + $0x70] sm:$0xff] %v670_v7  ;;  %v663_v14 = vmax.f32 %v647_v8, 0.0  ;;  %v671_v15 = vmax.f32 %v655_v9, 0.0 }
 0x15e   : > { %676 = vst [vmem:[%s1409_s22 + $0x20] sm:$0xff] %v660_v10  ;;  %684 = vst [vmem:[%s1409_s22 + $0x60] sm:$0xff] %v668_v11  ;;  %v661_v16 = vmax.f32 %v645_v12, 0.0  ;;  %v669_v17 = vmax.f32 %v653_v13, 0.0 }
 0x15f   : > { %679 = vst [vmem:[%s1409_s22 + $0x38] sm:$0xff] %v663_v14  ;;  %687 = vst [vmem:[%s1409_s22 + $0x78] sm:$0xff] %v671_v15 }
 0x160   : > { %677 = vst [vmem:[%s1409_s22 + $0x28] sm:$0xff] %v661_v16  ;;  %685 = vst [vmem:[%s1409_s22 + $0x68] sm:$0xff] %v669_v17 }
 0x161   : > { %1096 = shalt.err (!%p1093_p5)
}
 0x162   : > { %s1097_s23 = scalar_lea.hbm %s1442_s9, 2048  ;;  %s1101_s14 = scalar_lea.hbm %s1502_s4, 8192 }
 0x163   : > { %p1098_p9 = scmp.ne.s32.totalorder %s1442_s9, %s1097_s23  ;;  %p1102_p3 = scmp.lt.u32.totalorder %s1442_s9, %s1502_s4 }
 0x164   : > { %p1103_p7 = scmp.lt.u32.totalorder %s1101_s14, %s1097_s23  ;;  %p1105_p4 = scmp.lt.u32.totalorder %s1097_s23, %s1442_s9 }
 0x165   : > { %p1099_p1 = pnand %p1098_p9, %p1301_p11 }
 0x166   : > { %p1104_p13 = por %p1103_p7, %p1102_p3 }
 0x167   : > { %p1100_p2 = pneg %p1099_p1 }
 0x168   : > { %p1106_p6 = por %p1105_p4, %p1104_p13 }
 0x16a   : > { %p1107_p8 = pnand %p1106_p6, %p1100_p2 }
 0x16c   : > { %1110 = shalt.err (!%p1107_p8)
}
 0x16d   : > { %s1176_s28 = smov 128   ;;  %s1177_s18 = smov 8  }
 0x16e   : > { %938 = dma.vmem_to_hbm [thread:$0]  (%p1301_p11), %s1444_s8, 2048, %s1442_s9, %s689_s11, %s1176_s28, %s1176_s28, %s1177_s18  }
 0x16f PF: > { %p955_p12 = scmp.ge.s32.totalorder %s1169_s20, 2  ;;  %s718_s6 = sand.u32 1, %s1149_s15  }
 0x170   : > { %p1520_p10 = scmp.ne.s32.totalorder %s1510_s26, 0  ;;  %s719_s13 = scalar_lea.sflag [#allocation5], %s718_s6 }
 0x172   : > { %p949_p0 = pnand %p955_p12, %p1520_p10 }
 0x174   : > { %1144 = dma.done.wait (!%p949_p0), %s719_s13, 2048  }
 0x175   : > { %1146 = vsyncadd (!%p949_p0), %s719_s13, 4294965248  ;;  %s21_s20 = sadd.s32 1, %s1169_s20   ;;  %s1521_s15 = smov %s1153_s16 }
 0x176   : > { %p18_p5 = scmp.ge.s32.totalorder %s21_s20, 6   ;;  %s1522_s16 = smov %s1157_s17 }
 0x177   : > { %s1523_s17 = smov %s1310_s10  ;;  %s1524_s18 = smov %s1165_s19 }
 0x178   : > { %s1525_s19 = smov %s1527_s5  ;;  %20 = sbr.rel (!%p18_p5) target bundleno = 7 (0x7), region = 100 }
 0x17f   :  { %724 = vsyncpa [#allocation4], 1 }
 0x180   :  { %726 = vsyncpa [#allocation4 + $0x1], 1 }
 0x181   :  { %727 = vsyncpa [#allocation7], 1 }
 0x182   :  { %728 = vsyncpa [#allocation5], 1 }
 0x183   :  { %730 = vsyncpa [#allocation5 + $0x1], 1 }

</bundles_post_ra>
